<compile_context>
chip_gen: v7x
topology: tpu7x:2x2x1
jax: 0.10.0
libtpu: 0.0.40
codegen_flags: <defaults>
</compile_context>

<pallas_src>
import functools

import jax
import jax.numpy as jnp
from jax import lax
from jax.experimental import pallas as pl
from jax.experimental.pallas import tpu as pltpu


_NEG_SLOPE = 0.2


def _round_up(a: int, m: int) -> int:
    return ((a + m - 1) // m) * m


def _make_discriminator_kernel(n_hidden: int, negative_slope: float = _NEG_SLOPE):
    """Fused MLP kernel: n_hidden x (Linear+LeakyReLU) + final Linear(→1)."""

    def kernel(x_ref, *refs):
        # refs = [W0, b0, W1, b1, ..., w_last(1,H), b_last(1,1), out]
        o_ref = refs[-1]
        h = x_ref[...]  # (R, packdim) bf16
        idx = 0
        for _ in range(n_hidden):
            w = refs[idx][...]                               # (in, out) bf16
            b = refs[idx + 1][...].astype(jnp.float32)       # (1, out) f32
            idx += 2
            # bf16 MXU operands, f32 accumulation.
            h = jnp.dot(h.astype(jnp.bfloat16), w,
                        preferred_element_type=jnp.float32) + b
            # LeakyReLU(0.2): max(h, 0.2*h)
            h = jnp.maximum(h, negative_slope * h)
            # Dropout(0.5): identity (eval mode)
        w_row = refs[idx][...]                               # (1, H_last) bf16
        b_last = refs[idx + 1][...].astype(jnp.float32)      # (1, 1) f32
        # Final Linear: contract on h's last axis -> lane-dense (1, R) row.
        # No explicit h.T (avoids XLU transpose) and no N=1 matmul.
        scores = lax.dot_general(
            w_row, h.astype(jnp.bfloat16),
            dimension_numbers=(((1,), (1,)), ((), ())),
            preferred_element_type=jnp.float32,
        ) + b_last
        o_ref[...] = scores.astype(o_ref.dtype)

    return kernel


def _vmem_budget_bytes() -> int:
    """Per-generation VMEM budget: 3/4 of physical capacity (v7x: 64 MiB)."""
    try:
        cap = int(pltpu.get_tpu_info().vmem_capacity_bytes)
    except Exception:
        cap = 64 * 1024 * 1024  # conservative fallback (v7x per-TC)
    return (cap * 3) // 4


def _choose_block_rows(rows: int, packdim: int, widths, param_bytes: int) -> int:
    """Row tile sized from the full VMEM working set (not a fixed byte target)."""
    budget = _vmem_budget_bytes() - 2 * param_bytes
    max_w = max([packdim] + list(widths))
    per_row = (
        2 * packdim * 2      # bf16 x tile, double-buffered
        + 2 * 4              # f32 (1, R) out tile, double-buffered
        + 4 * max_w * 4      # f32 working activations (generous headroom)
    )
    r = max(256, budget // max(1, per_row))
    r = int(min(8192, (r // 256) * 256))
    rows_pad_min = _round_up(max(rows, 1), 256)
    r = min(r, rows_pad_min)
    # v7x megacore: guarantee >= 2 "parallel" grid steps once rows permit.
    if rows_pad_min >= 512:
        half = max(256, ((rows_pad_min // 2) // 256) * 256)
        r = min(r, half)
    return r


def _vmem_limit_bytes(block_rows, packdim, widths, param_bytes) -> int:
    """Scoped-VMEM limit for the chosen tile, clamped to the chip budget."""
    max_w = max([packdim] + list(widths))
    need = (
        2 * block_rows * packdim * 2       # double-buffered bf16 x
        + 2 * block_rows * 4               # double-buffered f32 out
        + 2 * param_bytes                  # (possibly double-buffered) params
        + 4 * block_rows * max_w * 4       # f32 activations
    )
    return int(min(max(int(need * 1.5), 8 * 1024 * 1024), _vmem_budget_bytes()))


def init_discriminator_params(key, input_dim, dis_dims, pack=1,
                              w_dtype=jnp.bfloat16, b_dtype=jnp.float32):
    """Deterministic parameter init (shapes match the PyTorch module).

    Weights are stored as (in_features, out_features) in bf16; biases in f32."""
    params = []
    dim = input_dim * pack
    dims = list(dis_dims) + [1]
    for out_dim in dims:
        key, kw, kb = jax.random.split(key, 3)
        bound = 1.0 / float(jnp.sqrt(dim))
        w = jax.random.uniform(kw, (dim, out_dim), jnp.float32,
                               minval=-bound, maxval=bound).astype(w_dtype)
        b = jax.random.uniform(kb, (1, out_dim), jnp.float32,
                               minval=-bound, maxval=bound).astype(b_dtype)
        params.append((w, b))
        dim = out_dim
    return params


@functools.partial(jax.jit, static_argnames=("pack",))
def discriminator_forward(x, params, pack=1):
    """Pallas forward pass. x: (B, input_dim); returns (B // pack, 1) float32."""
    B, in_dim = x.shape
    assert B % pack == 0
    packdim = in_dim * pack
    xr = x.reshape(-1, packdim)            # view(-1, packdim)
    rows = xr.shape[0]
    # bf16 input: halves the roofline x DMA; identical math since the first
    # matmul operand is cast to bf16 anyway.
    xr = xr.astype(jnp.bfloat16)

    n_hidden = len(params) - 1
    widths = [w.shape[1] for w, _ in params]
    param_bytes = sum(w.size * 2 + b.size * 4 for w, b in params)

    block_rows = _choose_block_rows(rows, packdim, widths, param_bytes)
    rows_pad = int(pl.cdiv(rows, block_rows)) * block_rows
    if rows_pad != rows:
        xr = jnp.pad(xr, ((0, rows_pad - rows), (0, 0)))

    kernel = _make_discriminator_kernel(n_hidden)

    flat_inputs = [xr]
    in_specs = [pl.BlockSpec((block_rows, packdim), lambda i: (i, 0))]
    for li, (w, b) in enumerate(params):
        w = w.astype(jnp.bfloat16)
        b = b.astype(jnp.float32)
        if li == n_hidden:
            w = w.T                 # (1, H_last): row form for lane-dense finale
            b = b.reshape(1, 1)
        flat_inputs += [w, b]
        # Full-array blocks, constant index_map -> loaded once, VMEM-resident.
        in_specs += [
            pl.BlockSpec(w.shape, lambda i: (0, 0)),
            pl.BlockSpec(b.shape, lambda i: (0, 0)),
        ]

    out = pl.pallas_call(
        kernel,
        out_shape=jax.ShapeDtypeStruct((1, rows_pad), jnp.float32),
        grid=(rows_pad // block_rows,),
        in_specs=in_specs,
        out_specs=pl.BlockSpec((1, block_rows), lambda i: (0, i)),
        compiler_params=pltpu.CompilerParams(
            dimension_semantics=("parallel",),
            vmem_limit_bytes=_vmem_limit_bytes(
                block_rows, packdim, widths, param_bytes
            ),
        ),
    )(*flat_inputs)

    return out[0, :rows].reshape(rows, 1)


def _reference_forward_f32(x, params, pack=1):
    """Pure-JAX f32 reference (eval-mode dropout) — PyTorch semantics."""
    packdim = x.shape[1] * pack
    h = x.reshape(-1, packdim).astype(jnp.float32)
    for w, b in params[:-1]:
        h = h @ w.astype(jnp.float32) + b.astype(jnp.float32)
        h = jnp.where(h > 0, h, _NEG_SLOPE * h)
    w, b = params[-1]
    return h @ w.astype(jnp.float32) + b.astype(jnp.float32)


def _reference_forward_bf16(x, params, pack=1):
    """Pure-JAX reference matching the kernel math (bf16 MXU, f32 accum)."""
    packdim = x.shape[1] * pack
    h = x.reshape(-1, packdim).astype(jnp.bfloat16)
    for w, b in params[:-1]:
        h = jnp.dot(h.astype(jnp.bfloat16), w.astype(jnp.bfloat16),
                    preferred_element_type=jnp.float32) + b.astype(jnp.float32)
        h = jnp.maximum(h, _NEG_SLOPE * h)
    w, b = params[-1]
    return jnp.dot(h.astype(jnp.bfloat16), w.astype(jnp.bfloat16),
                   preferred_element_type=jnp.float32) + b.astype(jnp.float32)


if __name__ == "__main__":
    key = jax.random.PRNGKey(0)
    k_param, k_x = jax.random.split(key)

    batch = 8
    input_dim = 32
    dis_dims = (64, 32)
    pack = 1

    params = init_discriminator_params(k_param, input_dim, dis_dims, pack=pack)
    x = jax.random.normal(k_x, (batch, input_dim), dtype=jnp.float32)

    out = jax.block_until_ready(discriminator_forward(x, params, pack=pack))
    assert out.shape == (batch // pack, 1), out.shape

    # Tight check vs. a reference implementing the exact kernel math.
    ref_bf16 = _reference_forward_bf16(x, params, pack=pack)
    assert jnp.allclose(out, ref_bf16, atol=1e-3, rtol=1e-3), "mismatch vs bf16 ref"

    # Looser check vs. full-f32 PyTorch-semantics reference (bf16 MXU rounding).
    ref_f32 = _reference_forward_f32(x, params, pack=pack)
    assert jnp.allclose(out, ref_f32, atol=5e-2, rtol=5e-2), "mismatch vs f32 ref"

    # bf16-in-HBM input path (same code path; kernel math unchanged).
    out_bf16_in = jax.block_until_ready(
        discriminator_forward(x.astype(jnp.bfloat16), params, pack=pack))
    assert out_bf16_in.shape == (batch // pack, 1), out_bf16_in.shape
    assert jnp.allclose(out_bf16_in, ref_bf16, atol=1e-3, rtol=1e-3), "bf16-in mismatch"

    print("KERNEL_OK")
</pallas_src>

<mosaic_0001>
module attributes {stable_mosaic.version = 11 : i64} {
  func.func @kernel(%arg0: i32, %arg1: memref<256x32xbf16, #tpu.memory_space<vmem>>, %arg2: memref<32x64xbf16, #tpu.memory_space<vmem>>, %arg3: memref<1x64xf32, #tpu.memory_space<vmem>>, %arg4: memref<64x32xbf16, #tpu.memory_space<vmem>>, %arg5: memref<1x32xf32, #tpu.memory_space<vmem>>, %arg6: memref<1x32xbf16, #tpu.memory_space<vmem>>, %arg7: memref<1x1xf32, #tpu.memory_space<vmem>>, %arg8: memref<1x256xf32, #tpu.memory_space<vmem>>) attributes {dimension_semantics = [#tpu.dimension_semantics<parallel>], iteration_bounds = array<i64: 1>, scalar_prefetch = 0 : i64, scratch_operands = 0 : i64, tpu.core_type = #tpu.core_type<tc>, window_params = [{transform_indices = @transform_0, window_bounds = array<i64: 256, 32>}, {pipeline_mode = #tpu.pipeline_mode<synchronous>, transform_indices = @transform_1, window_bounds = array<i64: 32, 64>}, {pipeline_mode = #tpu.pipeline_mode<synchronous>, transform_indices = @transform_2, window_bounds = array<i64: 1, 64>}, {pipeline_mode = #tpu.pipeline_mode<synchronous>, transform_indices = @transform_3, window_bounds = array<i64: 64, 32>}, {pipeline_mode = #tpu.pipeline_mode<synchronous>, transform_indices = @transform_4, window_bounds = array<i64: 1, 32>}, {pipeline_mode = #tpu.pipeline_mode<synchronous>, transform_indices = @transform_5, window_bounds = array<i64: 1, 32>}, {pipeline_mode = #tpu.pipeline_mode<synchronous>, transform_indices = @transform_6, window_bounds = array<i64: 1, 1>}, {transform_indices = @transform_7, window_bounds = array<i64: 1, 256>}]} {
    %c0 = arith.constant 0 : index
    %c0_0 = arith.constant 0 : index
    %0 = vector.load %arg1[%c0, %c0_0] : memref<256x32xbf16, #tpu.memory_space<vmem>>, vector<256x32xbf16>
    %c0_1 = arith.constant 0 : index
    %c0_2 = arith.constant 0 : index
    %1 = vector.load %arg2[%c0_1, %c0_2] : memref<32x64xbf16, #tpu.memory_space<vmem>>, vector<32x64xbf16>
    %c0_3 = arith.constant 0 : index
    %c0_4 = arith.constant 0 : index
    %2 = vector.load %arg3[%c0_3, %c0_4] : memref<1x64xf32, #tpu.memory_space<vmem>>, vector<1x64xf32>
    %cst = arith.constant dense<0.000000e+00> : vector<256x64xf32>
    %3 = tpu.matmul %0, %1, %cst {dimension_numbers = #tpu.dot_dimension_numbers<[1], [0], [0], [1], [0, 0, 1, 1], [], []>} : vector<256x32xbf16>, vector<32x64xbf16>, vector<256x64xf32> -> vector<256x64xf32>
    %4 = vector.broadcast %2 : vector<1x64xf32> to vector<256x64xf32>
    %5 = arith.addf %3, %4 : vector<256x64xf32>
    %cst_5 = arith.constant 2.000000e-01 : f32
    %6 = vector.broadcast %cst_5 : f32 to vector<256x64xf32>
    %7 = arith.mulf %6, %5 : vector<256x64xf32>
    %8 = arith.maximumf %5, %7 : vector<256x64xf32>
    %c0_6 = arith.constant 0 : index
    %c0_7 = arith.constant 0 : index
    %9 = vector.load %arg4[%c0_6, %c0_7] : memref<64x32xbf16, #tpu.memory_space<vmem>>, vector<64x32xbf16>
    %c0_8 = arith.constant 0 : index
    %c0_9 = arith.constant 0 : index
    %10 = vector.load %arg5[%c0_8, %c0_9] : memref<1x32xf32, #tpu.memory_space<vmem>>, vector<1x32xf32>
    %11 = arith.truncf %8 : vector<256x64xf32> to vector<256x64xbf16>
    %cst_10 = arith.constant dense<0.000000e+00> : vector<256x32xf32>
    %12 = tpu.matmul %11, %9, %cst_10 {dimension_numbers = #tpu.dot_dimension_numbers<[1], [0], [0], [1], [0, 0, 1, 1], [], []>} : vector<256x64xbf16>, vector<64x32xbf16>, vector<256x32xf32> -> vector<256x32xf32>
    %13 = vector.broadcast %10 : vector<1x32xf32> to vector<256x32xf32>
    %14 = arith.addf %12, %13 : vector<256x32xf32>
    %cst_11 = arith.constant 2.000000e-01 : f32
    %15 = vector.broadcast %cst_11 : f32 to vector<256x32xf32>
    %16 = arith.mulf %15, %14 : vector<256x32xf32>
    %17 = arith.maximumf %14, %16 : vector<256x32xf32>
    %c0_12 = arith.constant 0 : index
    %c0_13 = arith.constant 0 : index
    %18 = vector.load %arg6[%c0_12, %c0_13] : memref<1x32xbf16, #tpu.memory_space<vmem>>, vector<1x32xbf16>
    %c0_14 = arith.constant 0 : index
    %c0_15 = arith.constant 0 : index
    %19 = vector.load %arg7[%c0_14, %c0_15] : memref<1x1xf32, #tpu.memory_space<vmem>>, vector<1x1xf32>
    %20 = arith.truncf %17 : vector<256x32xf32> to vector<256x32xbf16>
    %cst_16 = arith.constant dense<0.000000e+00> : vector<1x256xf32>
    %21 = tpu.matmul %18, %20, %cst_16 {dimension_numbers = #tpu.dot_dimension_numbers<[1], [1], [0], [0], [0, 0, 1, 0], [], []>} : vector<1x32xbf16>, vector<256x32xbf16>, vector<1x256xf32> -> vector<1x256xf32>
    %22 = vector.broadcast %19 : vector<1x1xf32> to vector<1x256xf32>
    %23 = arith.addf %21, %22 : vector<1x256xf32>
    %c0_17 = arith.constant 0 : index
    %c0_18 = arith.constant 0 : index
    %24 = vector.load %arg8[%c0_17, %c0_18] : memref<1x256xf32, #tpu.memory_space<vmem>>, vector<1x256xf32>
    tpu.vector_store %arg8[%c0_17, %c0_18], %23 {strides = array<i32>} : memref<1x256xf32, #tpu.memory_space<vmem>>, vector<1x256xf32>,
    return
  }
  func.func @transform_0(%arg0: i32) -> (i32, i32) {
    %c0_i32 = arith.constant 0 : i32
    %c0_i32_0 = arith.constant 0 : i32
    return %arg0, %c0_i32 : i32, i32
  }
  func.func @transform_1(%arg0: i32) -> (i32, i32) {
    %c0_i32 = arith.constant 0 : i32
    %c0_i32_0 = arith.constant 0 : i32
    %c0_i32_1 = arith.constant 0 : i32
    return %c0_i32, %c0_i32_0 : i32, i32
  }
  func.func @transform_2(%arg0: i32) -> (i32, i32) {
    %c0_i32 = arith.constant 0 : i32
    %c0_i32_0 = arith.constant 0 : i32
    %c0_i32_1 = arith.constant 0 : i32
    return %c0_i32, %c0_i32_0 : i32, i32
  }
  func.func @transform_3(%arg0: i32) -> (i32, i32) {
    %c0_i32 = arith.constant 0 : i32
    %c0_i32_0 = arith.constant 0 : i32
    %c0_i32_1 = arith.constant 0 : i32
    return %c0_i32, %c0_i32_0 : i32, i32
  }
  func.func @transform_4(%arg0: i32) -> (i32, i32) {
    %c0_i32 = arith.constant 0 : i32
    %c0_i32_0 = arith.constant 0 : i32
    %c0_i32_1 = arith.constant 0 : i32
    return %c0_i32, %c0_i32_0 : i32, i32
  }
  func.func @transform_5(%arg0: i32) -> (i32, i32) {
    %c0_i32 = arith.constant 0 : i32
    %c0_i32_0 = arith.constant 0 : i32
    %c0_i32_1 = arith.constant 0 : i32
    return %c0_i32, %c0_i32_0 : i32, i32
  }
  func.func @transform_6(%arg0: i32) -> (i32, i32) {
    %c0_i32 = arith.constant 0 : i32
    %c0_i32_0 = arith.constant 0 : i32
    %c0_i32_1 = arith.constant 0 : i32
    return %c0_i32, %c0_i32_0 : i32, i32
  }
  func.func @transform_7(%arg0: i32) -> (i32, i32) {
    %c0_i32 = arith.constant 0 : i32
    %c0_i32_0 = arith.constant 0 : i32
    return %c0_i32, %arg0 : i32, i32
  }
}

</mosaic_0001>

<bundles_post_ra>
// kernel: discriminator_forward.1
= control target key start
LH: loop header
LB: loop body
LE: loop exit
PB: predicated region body
PF: predicated region fallthrough
CT: control target
= control target key end

     0   :  { %vm164_vm0 = vcmask 261120   ;;  %vm493_vm1 = vcmask 523264   ;;  %s1404_s1 = inlined_call_operand.vmem [shape: bf16[32,64], index: 1, kind: input, shape index: {}]   ;;  %s1405_s0 = inlined_call_operand.vmem [shape: bf16[256,32], index: 0, kind: input, shape index: {}]   ;;  %s1406_s3 = inlined_call_operand.vmem [shape: bf16[64,32], index: 3, kind: input, shape index: {}]   ;;  %s1407_s2 = inlined_call_operand.vmem [shape: f32[1,64], index: 2, kind: input, shape index: {}]   ;;  %s1408_s5 = inlined_call_operand.vmem [shape: bf16[1,32], index: 5, kind: input, shape index: {}]   ;;  %s1409_s6 = inlined_call_operand.<no memory space> [shape: f32[1,1], index: 6, kind: input, shape index: {}]   ;;  %s1410_s4 = inlined_call_operand.vmem [shape: f32[1,32], index: 4, kind: input, shape index: {}]   ;;  %s1411_s7 = inlined_call_operand.vmem [shape: f32[1,256], index: 7, kind: output, shape index: {}]  }
   0x1   :  { %v1113_v0 = vld [vmem:[%s1404_s1] sm:$0xff]   ;;  %v1114_v1 = vld [vmem:[%s1404_s1 + $0x8] sm:$0xff]   ;;  %v1117_v4 = vld [vmem:[%s1405_s0 + $0x10] sm:$0xff]  }
   0x2   :  { %1026 = vmatprep.subr.bf16.mxu0 %v1113_v0  ;;  %v1115_v2 = vld [vmem:[%s1405_s0] sm:$0xff]   ;;  %v1116_v3 = vld [vmem:[%s1405_s0 + $0x8] sm:$0xff]   ;;  %v1118_v5 = vld [vmem:[%s1405_s0 + $0x18] sm:$0xff]  }
   0x3   :  { %1027 = vmatpush3.bf16.msra.mxu0 %v1113_v0  ;;  %1030 = vmatprep.mubr.msk.bf16.mxu0 %vm164_vm0, %v1115_v2  ;;  %v1119_v6 = vld [vmem:[%s1405_s0 + $0x20] sm:$0xff]   ;;  %v1120_v8 = vld [vmem:[%s1405_s0 + $0x28] sm:$0xff]   ;;  %v1121_v9 = vld [vmem:[%s1405_s0 + $0x30] sm:$0xff]  }
   0x4   :  { %1028 = vmatprep.subr.bf16.mxu0 %v1114_v1  ;;  %v1131_v7 = vld [vmem:[%s1406_s3] sm:$0xff]   ;;  %v1122_v10 = vld [vmem:[%s1405_s0 + $0x38] sm:$0xff]   ;;  %v1124_v12 = vld [vmem:[%s1405_s0 + $0x48] sm:$0xff]  }
   0x5   :  { %1062 = vmatprep.subr.bf16.mxu1 %v1131_v7  ;;  %v1123_v11 = vld [vmem:[%s1405_s0 + $0x40] sm:$0xff]   ;;  %v1125_v13 = vld [vmem:[%s1405_s0 + $0x50] sm:$0xff]   ;;  %v1126_v14 = vld [vmem:[%s1405_s0 + $0x58] sm:$0xff]  }
   0x6   :  { %1063 = vmatpush3.bf16.msra.mxu1 %v1131_v7  ;;  %v1127_v15 = vld [vmem:[%s1405_s0 + $0x60] sm:$0xff]   ;;  %v1128_v16 = vld [vmem:[%s1405_s0 + $0x68] sm:$0xff]   ;;  %v1129_v17 = vld [vmem:[%s1405_s0 + $0x70] sm:$0xff]  }
   0x7   :  { %1029 = vmatpush3.bf16.msra.mxu0 %v1114_v1  ;;  %v1130_v18 = vld [vmem:[%s1405_s0 + $0x78] sm:$0xff]   ;;  %v1132_v19 = vld [vmem:[%s1406_s3 + $0x8] sm:$0xff]   ;;  %v1133_v20 = vld [vmem:[%s1406_s3 + $0x10] sm:$0xff]  }
   0x8   :  { %1064 = vmatprep.subr.bf16.mxu1 %v1132_v19  ;;  %v1134_v21 = vld [vmem:[%s1406_s3 + $0x18] sm:$0xff]   ;;  %v1262_v22 = vld [vmem:[%s1407_s2] ss:$0 sm:$0xff] }
   0xa   :  { %1031 = vmatmul.mubr.msk.bf16.vlgmr.msra.gmra.mrb[0].mxu0 %vm164_vm0, %v1116_v3  ;;  %1065 = vmatpush3.bf16.msra.mxu1 %v1132_v19 }
   0xb   :  { %1034 = vmatprep.mubr.msk.bf16.mxu0 %vm164_vm0, %v1117_v4  ;;  %1066 = vmatprep.subr.bf16.mxu1 %v1133_v20 }
   0xe   :  { %1067 = vmatpush3.bf16.msra.mxu1 %v1133_v20 }
   0xf   :  { %1068 = vmatprep.subr.bf16.mxu1 %v1134_v21 }
  0x12   :  { %1035 = vmatmul.mubr.msk.bf16.gmra.mrb[4].mxu0 %vm164_vm0, %v1118_v5  ;;  %1069 = vmatpush3.bf16.msra.mxu1 %v1134_v21 }
  0x13   :  { %1038 = vmatprep.mubr.msk.bf16.mxu0 %vm164_vm0, %v1119_v6 }
  0x1a   :  { %1039 = vmatmul.mubr.msk.bf16.gmra.mrb[8].mxu0 %vm164_vm0, %v1120_v8 }
  0x1b   :  { %1042 = vmatprep.mubr.msk.bf16.mxu0 %vm164_vm0, %v1121_v9 }
  0x22   :  { %1043 = vmatmul.mubr.msk.bf16.gmra.mrb[12].mxu0 %vm164_vm0, %v1122_v10 }
  0x23   :  { %1046 = vmatprep.mubr.msk.bf16.mxu0 %vm164_vm0, %v1123_v11 }
  0x2a   :  { %1047 = vmatmul.mubr.msk.bf16.gmra.mrb[16].mxu0 %vm164_vm0, %v1124_v12 }
  0x2b   :  { %1050 = vmatprep.mubr.msk.bf16.mxu0 %vm164_vm0, %v1125_v13 }
  0x32   :  { %1051 = vmatmul.mubr.msk.bf16.gmra.mrb[20].mxu0 %vm164_vm0, %v1126_v14 }
  0x33   :  { %1054 = vmatprep.mubr.msk.bf16.mxu0 %vm164_vm0, %v1127_v15 }
  0x3a   :  { %1055 = vmatmul.mubr.msk.bf16.gmra.mrb[24].mxu0 %vm164_vm0, %v1128_v16 }
  0x3b   :  { %1058 = vmatprep.mubr.msk.bf16.mxu0 %vm164_vm0, %v1129_v17 }
  0x42   :  { %1059 = vmatmul.mubr.msk.bf16.gmra.mrb[28].mxu0 %vm164_vm0, %v1130_v18 }
  0xdd   :  { %v1032_v23 = vpop.f32.mrb[0].mxu0 }
  0xde   :  { %v256_v24 = vadd.f32 %v1032_v23, %v1262_v22  ;;  %v247_v25 = vpop.f32.mrb[1].mxu0 }
  0xdf   :  { %v248_v26 = vadd.f32 %v1262_v22, %v247_v25  ;;  %v1033_v27 = vpop.f32.mrb[2].mxu0 }
  0xe0   :  { %v376_v28 = vmul.f32 0.2, %v256_v24  ;;  %v259_v29 = vadd.f32 %v1033_v27, %v1262_v22  ;;  %v250_v30 = vpop.f32.mrb[3].mxu0 }
  0xe1   :  { %v374_v31 = vmul.f32 0.2, %v248_v26  ;;  %v251_v32 = vadd.f32 %v1262_v22, %v250_v30 }
  0xe2   :  { %v377_v33 = vmul.f32 0.2, %v259_v29  ;;  %v408_v35 = vmax.f32 %v256_v24, %v376_v28 }
  0xe3   :  { %v375_v34 = vmul.f32 0.2, %v251_v32  ;;  %v406_v37 = vmax.f32 %v248_v26, %v374_v31 }
  0xe4   :  { %v409_v36 = vmax.f32 %v259_v29, %v377_v33 }
  0xe5   :  { %v407_v38 = vmax.f32 %v251_v32, %v375_v34  ;;  %v1036_v39 = vpop.f32.mrb[4].mxu0 }
  0xe6   :  { %v448_v40 = vpack.c.bf16 %v409_v36, %v408_v35  ;;  %v272_v41 = vadd.f32 %v1036_v39, %v1262_v22  ;;  %v263_v42 = vpop.f32.mrb[5].mxu0 }
  0xe7   :  { %v264_v43 = vadd.f32 %v1262_v22, %v263_v42  ;;  %v1037_v44 = vpop.f32.mrb[6].mxu0  ;;  %v447_v45 = vpack.c.bf16 %v407_v38, %v406_v37 }
  0xe8   :  { %v380_v46 = vmul.f32 0.2, %v272_v41  ;;  %v275_v47 = vadd.f32 %v1037_v44, %v1262_v22  ;;  %v266_v48 = vpop.f32.mrb[7].mxu0 }
  0xe9   :  { %v378_v49 = vmul.f32 0.2, %v264_v43  ;;  %v267_v50 = vadd.f32 %v1262_v22, %v266_v48  ;;  %1070 = vmatprep.mubr.msk.bf16.mxu1 %vm493_vm1, %v447_v45 }
  0xea   :  { %v381_v51 = vmul.f32 0.2, %v275_v47  ;;  %1071 = vmatmul.mubr.msk.bf16.vlgmr.msra.gmra.mrb[0].mxu1 %vm493_vm1, %v448_v40  ;;  %v412_v53 = vmax.f32 %v272_v41, %v380_v46 }
  0xeb   :  { %v379_v52 = vmul.f32 0.2, %v267_v50  ;;  %v410_v55 = vmax.f32 %v264_v43, %v378_v49 }
  0xec   :  { %v413_v54 = vmax.f32 %v275_v47, %v381_v51 }
  0xed   :  { %v411_v56 = vmax.f32 %v267_v50, %v379_v52  ;;  %v1040_v57 = vpop.f32.mrb[8].mxu0 }
  0xee   :  { %v450_v58 = vpack.c.bf16 %v413_v54, %v412_v53  ;;  %v288_v59 = vadd.f32 %v1040_v57, %v1262_v22  ;;  %v279_v60 = vpop.f32.mrb[9].mxu0 }
  0xef   :  { %v449_v61 = vpack.c.bf16 %v411_v56, %v410_v55  ;;  %v280_v62 = vadd.f32 %v1262_v22, %v279_v60  ;;  %v1041_v63 = vpop.f32.mrb[10].mxu0 }
  0xf0   :  { %v384_v0 = vmul.f32 0.2, %v288_v59  ;;  %v291_v1 = vadd.f32 %v1041_v63, %v1262_v22  ;;  %v282_v2 = vpop.f32.mrb[11].mxu0 }
  0xf1   :  { %v382_v3 = vmul.f32 0.2, %v280_v62  ;;  %v283_v4 = vadd.f32 %v1262_v22, %v282_v2  ;;  %1074 = vmatprep.mubr.msk.bf16.mxu1 %vm493_vm1, %v449_v61 }
  0xf2   :  { %v385_v5 = vmul.f32 0.2, %v291_v1  ;;  %1075 = vmatmul.mubr.msk.bf16.gmra.mrb[4].mxu1 %vm493_vm1, %v450_v58  ;;  %v416_v7 = vmax.f32 %v288_v59, %v384_v0 }
  0xf3   :  { %v383_v6 = vmul.f32 0.2, %v283_v4  ;;  %v414_v9 = vmax.f32 %v280_v62, %v382_v3 }
  0xf4   :  { %v417_v8 = vmax.f32 %v291_v1, %v385_v5 }
  0xf5   :  { %v415_v10 = vmax.f32 %v283_v4, %v383_v6  ;;  %v1044_v11 = vpop.f32.mrb[12].mxu0 }
  0xf6   :  { %v452_v12 = vpack.c.bf16 %v417_v8, %v416_v7  ;;  %v304_v13 = vadd.f32 %v1044_v11, %v1262_v22  ;;  %v295_v14 = vpop.f32.mrb[13].mxu0 }
  0xf7   :  { %v451_v15 = vpack.c.bf16 %v415_v10, %v414_v9  ;;  %v296_v16 = vadd.f32 %v1262_v22, %v295_v14  ;;  %v1045_v17 = vpop.f32.mrb[14].mxu0 }
  0xf8   :  { %v388_v18 = vmul.f32 0.2, %v304_v13  ;;  %v307_v19 = vadd.f32 %v1045_v17, %v1262_v22  ;;  %v298_v20 = vpop.f32.mrb[15].mxu0 }
  0xf9   :  { %v386_v21 = vmul.f32 0.2, %v296_v16  ;;  %v299_v23 = vadd.f32 %v1262_v22, %v298_v20  ;;  %1078 = vmatprep.mubr.msk.bf16.mxu1 %vm493_vm1, %v451_v15 }
  0xfa   :  { %v389_v24 = vmul.f32 0.2, %v307_v19  ;;  %1079 = vmatmul.mubr.msk.bf16.gmra.mrb[8].mxu1 %vm493_vm1, %v452_v12  ;;  %v420_v26 = vmax.f32 %v304_v13, %v388_v18 }
  0xfb   :  { %v387_v25 = vmul.f32 0.2, %v299_v23  ;;  %v418_v28 = vmax.f32 %v296_v16, %v386_v21 }
  0xfc   :  { %v421_v27 = vmax.f32 %v307_v19, %v389_v24 }
  0xfd   :  { %v419_v29 = vmax.f32 %v299_v23, %v387_v25  ;;  %v1048_v30 = vpop.f32.mrb[16].mxu0 }
  0xfe   :  { %v454_v31 = vpack.c.bf16 %v421_v27, %v420_v26  ;;  %v320_v32 = vadd.f32 %v1048_v30, %v1262_v22  ;;  %v311_v33 = vpop.f32.mrb[17].mxu0 }
  0xff   :  { %v453_v34 = vpack.c.bf16 %v419_v29, %v418_v28  ;;  %v312_v35 = vadd.f32 %v1262_v22, %v311_v33  ;;  %v1049_v36 = vpop.f32.mrb[18].mxu0 }
 0x100   :  { %v392_v37 = vmul.f32 0.2, %v320_v32  ;;  %v323_v38 = vadd.f32 %v1049_v36, %v1262_v22  ;;  %v314_v39 = vpop.f32.mrb[19].mxu0 }
 0x101   :  { %v390_v40 = vmul.f32 0.2, %v312_v35  ;;  %v315_v41 = vadd.f32 %v1262_v22, %v314_v39  ;;  %1082 = vmatprep.mubr.msk.bf16.mxu1 %vm493_vm1, %v453_v34 }
 0x102   :  { %v393_v42 = vmul.f32 0.2, %v323_v38  ;;  %1083 = vmatmul.mubr.msk.bf16.gmra.mrb[12].mxu1 %vm493_vm1, %v454_v31  ;;  %v424_v44 = vmax.f32 %v320_v32, %v392_v37 }
 0x103   :  { %v391_v43 = vmul.f32 0.2, %v315_v41  ;;  %v422_v46 = vmax.f32 %v312_v35, %v390_v40 }
 0x104   :  { %v425_v45 = vmax.f32 %v323_v38, %v393_v42  ;;  %v12_v42 = vstv %s1409_s6 }
 0x105   :  { %v423_v47 = vmax.f32 %v315_v41, %v391_v43  ;;  %v1052_v48 = vpop.f32.mrb[20].mxu0  ;;  %v1315_v41 = vld [vmem:[%s1408_s5] sm:$0x1]  ;;  %13 = vst [vmem:[#allocation2] sm:$0x1] %v12_v42 }
 0x106   :  { %v456_v49 = vpack.c.bf16 %v425_v45, %v424_v44  ;;  %v336_v50 = vadd.f32 %v1052_v48, %v1262_v22  ;;  %v327_v51 = vpop.f32.mrb[21].mxu0  ;;  %1024 = vmatprep.mubr.msk.bf16.mxu0 %vm164_vm0, %v1315_v41  ;;  %v1325_v44 = vld [vmem:[%s1410_s4] ss:$0 sm:$0xff] }
 0x107   :  { %v455_v52 = vpack.c.bf16 %v423_v47, %v422_v46  ;;  %v328_v53 = vadd.f32 %v1262_v22, %v327_v51  ;;  %v1053_v54 = vpop.f32.mrb[22].mxu0 }
 0x108   :  { %v396_v55 = vmul.f32 0.2, %v336_v50  ;;  %v339_v56 = vadd.f32 %v1053_v54, %v1262_v22  ;;  %v330_v57 = vpop.f32.mrb[23].mxu0 }
 0x109   :  { %v394_v58 = vmul.f32 0.2, %v328_v53  ;;  %v331_v59 = vadd.f32 %v1262_v22, %v330_v57  ;;  %1086 = vmatprep.mubr.msk.bf16.mxu1 %vm493_vm1, %v455_v52 }
 0x10a   :  { %v428_v60 = vmax.f32 %v336_v50, %v396_v55  ;;  %v397_v61 = vmul.f32 0.2, %v339_v56  ;;  %1087 = vmatmul.mubr.msk.bf16.gmra.mrb[16].mxu1 %vm493_vm1, %v456_v49 }
 0x10b   :  { %v426_v62 = vmax.f32 %v328_v53, %v394_v58  ;;  %v395_v63 = vmul.f32 0.2, %v331_v59 }
 0x10c   :  { %v429_v0 = vmax.f32 %v339_v56, %v397_v61  ;;  %v768_v43 = vld [vmem:[#allocation2] sm:$0x1] }
 0x10d   :  { %v427_v1 = vmax.f32 %v331_v59, %v395_v63  ;;  %v1056_v2 = vpop.f32.mrb[24].mxu0 }
 0x10e   :  { %v458_v3 = vpack.c.bf16 %v429_v0, %v428_v60  ;;  %v352_v4 = vadd.f32 %v1056_v2, %v1262_v22  ;;  %v343_v5 = vpop.f32.mrb[25].mxu0 }
 0x10f   :  { %v457_v6 = vpack.c.bf16 %v427_v1, %v426_v62  ;;  %v344_v7 = vadd.f32 %v1262_v22, %v343_v5  ;;  %v1057_v8 = vpop.f32.mrb[26].mxu0 }
 0x110   :  { %v400_v9 = vmul.f32 0.2, %v352_v4  ;;  %v355_v10 = vadd.f32 %v1057_v8, %v1262_v22  ;;  %v346_v11 = vpop.f32.mrb[27].mxu0 }
 0x111   :  { %1090 = vmatprep.mubr.msk.bf16.mxu1 %vm493_vm1, %v457_v6  ;;  %v398_v12 = vmul.f32 0.2, %v344_v7  ;;  %v347_v13 = vadd.f32 %v1262_v22, %v346_v11 }
 0x112   :  { %v432_v14 = vmax.f32 %v352_v4, %v400_v9  ;;  %1091 = vmatmul.mubr.msk.bf16.gmra.mrb[20].mxu1 %vm493_vm1, %v458_v3  ;;  %v401_v15 = vmul.f32 0.2, %v355_v10 }
 0x113   :  { %v430_v16 = vmax.f32 %v344_v7, %v398_v12  ;;  %v399_v17 = vmul.f32 0.2, %v347_v13 }
 0x114   :  { %v433_v18 = vmax.f32 %v355_v10, %v401_v15 }
 0x115   :  { %v431_v19 = vmax.f32 %v347_v13, %v399_v17  ;;  %v1060_v20 = vpop.f32.mrb[28].mxu0 }
 0x116   :  { %v460_v21 = vpack.c.bf16 %v433_v18, %v432_v14  ;;  %v368_v23 = vadd.f32 %v1060_v20, %v1262_v22  ;;  %v359_v24 = vpop.f32.mrb[29].mxu0 }
 0x117   :  { %v459_v25 = vpack.c.bf16 %v431_v19, %v430_v16  ;;  %v360_v26 = vadd.f32 %v1262_v22, %v359_v24  ;;  %v1061_v27 = vpop.f32.mrb[30].mxu0 }
 0x118   :  { %v404_v28 = vmul.f32 0.2, %v368_v23  ;;  %v371_v29 = vadd.f32 %v1061_v27, %v1262_v22  ;;  %v362_v30 = vpop.f32.mrb[31].mxu0 }
 0x119   :  { %1094 = vmatprep.mubr.msk.bf16.mxu1 %vm493_vm1, %v459_v25  ;;  %v402_v31 = vmul.f32 0.2, %v360_v26  ;;  %v363_v32 = vadd.f32 %v1262_v22, %v362_v30  ;;  %v1135_v22 = vmov 0  }
 0x11a   :  { %1095 = vmatmul.mubr.msk.bf16.gmra.mrb[24].mxu1 %vm493_vm1, %v460_v21  ;;  %v436_v33 = vmax.f32 %v368_v23, %v404_v28  ;;  %v405_v34 = vmul.f32 0.2, %v371_v29  ;;  %1112 = vset.pattern.permute.xlu0 %v1135_v22 }
 0x11b   :  { %v434_v35 = vmax.f32 %v360_v26, %v402_v31  ;;  %v403_v36 = vmul.f32 0.2, %v363_v32  ;;  %787 = vperm.xlu0 %1112, %v768_v43  }
 0x11c   :  { %v437_v37 = vmax.f32 %v371_v29, %v405_v34 }
 0x11d   :  { %v435_v38 = vmax.f32 %v363_v32, %v403_v36 }
 0x11e   :  { %v462_v39 = vpack.c.bf16 %v437_v37, %v436_v33 }
 0x11f   :  { %v461_v40 = vpack.c.bf16 %v435_v38, %v434_v35 }
 0x121   :  { %1098 = vmatprep.mubr.msk.bf16.mxu1 %vm493_vm1, %v461_v40 }
 0x122   :  { %1099 = vmatmul.mubr.msk.bf16.gmra.mrb[28].mxu1 %vm493_vm1, %v462_v39 }
 0x1bd   :  { %v1072_v45 = vpop.f32.mrb[0].mxu1 }
 0x1be   :  { %v585_v46 = vadd.f32 %v1072_v45, %v1325_v44  ;;  %v576_v47 = vpop.f32.mrb[1].mxu1 }
 0x1bf   :  { %v577_v48 = vadd.f32 %v1325_v44, %v576_v47  ;;  %v1073_v49 = vpop.f32.mrb[2].mxu1 }
 0x1c0   :  { %v705_v50 = vmul.f32 0.2, %v585_v46  ;;  %v588_v51 = vadd.f32 %v1073_v49, %v1325_v44  ;;  %v579_v52 = vpop.f32.mrb[3].mxu1 }
 0x1c1   :  { %v703_v53 = vmul.f32 0.2, %v577_v48  ;;  %v580_v54 = vadd.f32 %v1325_v44, %v579_v52 }
 0x1c2   :  { %v706_v55 = vmul.f32 0.2, %v588_v51  ;;  %v737_v57 = vmax.f32 %v585_v46, %v705_v50 }
 0x1c3   :  { %v704_v56 = vmul.f32 0.2, %v580_v54  ;;  %v735_v59 = vmax.f32 %v577_v48, %v703_v53 }
 0x1c4   :  { %v738_v58 = vmax.f32 %v588_v51, %v706_v55 }
 0x1c5   :  { %v736_v60 = vmax.f32 %v580_v54, %v704_v56  ;;  %v1076_v61 = vpop.f32.mrb[4].mxu1 }
 0x1c6   :  { %v1331_v62 = vpack.c.bf16 %v738_v58, %v737_v57  ;;  %v601_v63 = vadd.f32 %v1076_v61, %v1325_v44  ;;  %v592_v0 = vpop.f32.mrb[5].mxu1 }
 0x1c7   :  { %v1334_v1 = vpack.c.bf16 %v736_v60, %v735_v59  ;;  %v593_v2 = vadd.f32 %v1325_v44, %v592_v0  ;;  %v1077_v3 = vpop.f32.mrb[6].mxu1 }
 0x1c8   :  { %v709_v4 = vmul.f32 0.2, %v601_v63  ;;  %v604_v5 = vadd.f32 %v1077_v3, %v1325_v44  ;;  %v595_v6 = vpop.f32.mrb[7].mxu1 }
 0x1c9   :  { %v707_v7 = vmul.f32 0.2, %v593_v2  ;;  %v596_v8 = vadd.f32 %v1325_v44, %v595_v6 }
 0x1ca   :  { %v710_v9 = vmul.f32 0.2, %v604_v5  ;;  %v741_v11 = vmax.f32 %v601_v63, %v709_v4 }
 0x1cb   :  { %v708_v10 = vmul.f32 0.2, %v596_v8  ;;  %v739_v13 = vmax.f32 %v593_v2, %v707_v7 }
 0x1cc   :  { %v742_v12 = vmax.f32 %v604_v5, %v710_v9 }
 0x1cd   :  { %v740_v14 = vmax.f32 %v596_v8, %v708_v10  ;;  %v1080_v15 = vpop.f32.mrb[8].mxu1 }
 0x1ce   :  { %v1339_v16 = vpack.c.bf16 %v742_v12, %v741_v11  ;;  %v617_v17 = vadd.f32 %v1080_v15, %v1325_v44  ;;  %v608_v18 = vpop.f32.mrb[9].mxu1 }
 0x1cf   :  { %v1342_v19 = vpack.c.bf16 %v740_v14, %v739_v13  ;;  %v609_v20 = vadd.f32 %v1325_v44, %v608_v18  ;;  %v1081_v21 = vpop.f32.mrb[10].mxu1 }
 0x1d0   :  { %v713_v23 = vmul.f32 0.2, %v617_v17  ;;  %v620_v24 = vadd.f32 %v1081_v21, %v1325_v44  ;;  %v611_v25 = vpop.f32.mrb[11].mxu1 }
 0x1d1   :  { %v711_v26 = vmul.f32 0.2, %v609_v20  ;;  %v612_v27 = vadd.f32 %v1325_v44, %v611_v25 }
 0x1d2   :  { %v714_v28 = vmul.f32 0.2, %v620_v24  ;;  %v745_v30 = vmax.f32 %v617_v17, %v713_v23 }
 0x1d3   :  { %v712_v29 = vmul.f32 0.2, %v612_v27  ;;  %v743_v32 = vmax.f32 %v609_v20, %v711_v26 }
 0x1d4   :  { %v746_v31 = vmax.f32 %v620_v24, %v714_v28  ;;  %v798_v24 = vsel %vm164_vm0, %v1334_v1, 0 }
 0x1d5   :  { %v744_v33 = vmax.f32 %v612_v27, %v712_v29  ;;  %v1084_v34 = vpop.f32.mrb[12].mxu1 }
 0x1d6   :  { %v1347_v35 = vpack.c.bf16 %v746_v31, %v745_v30  ;;  %v633_v36 = vadd.f32 %v1084_v34, %v1325_v44  ;;  %v624_v37 = vpop.f32.mrb[13].mxu1 }
 0x1d7   :  { %v1350_v38 = vpack.c.bf16 %v744_v33, %v743_v32  ;;  %v625_v39 = vadd.f32 %v1325_v44, %v624_v37  ;;  %v1085_v40 = vpop.f32.mrb[14].mxu1 }
 0x1d8   :  { %v717_v22 = vmul.f32 0.2, %v633_v36  ;;  %v636_v42 = vadd.f32 %v1085_v40, %v1325_v44  ;;  %v627_v43 = vpop.f32.mrb[15].mxu1 }
 0x1d9   :  { %v715_v45 = vmul.f32 0.2, %v625_v39  ;;  %v628_v46 = vadd.f32 %v1325_v44, %v627_v43 }
 0x1da   :  { %v718_v47 = vmul.f32 0.2, %v636_v42  ;;  %v749_v49 = vmax.f32 %v633_v36, %v717_v22 }
 0x1db   :  { %v716_v48 = vmul.f32 0.2, %v628_v46  ;;  %v747_v51 = vmax.f32 %v625_v39, %v715_v45 }
 0x1dc   :  { %v750_v50 = vmax.f32 %v636_v42, %v718_v47  ;;  %v801_v42 = vsel %vm164_vm0, %v1331_v62, 0 }
 0x1dd   :  { %v748_v52 = vmax.f32 %v628_v46, %v716_v48  ;;  %v1088_v53 = vpop.f32.mrb[16].mxu1 }
 0x1de   :  { %v1355_v54 = vpack.c.bf16 %v750_v50, %v749_v49  ;;  %v649_v55 = vadd.f32 %v1088_v53, %v1325_v44  ;;  %v640_v56 = vpop.f32.mrb[17].mxu1 }
 0x1df   :  { %v1358_v57 = vpack.c.bf16 %v748_v52, %v747_v51  ;;  %v641_v58 = vadd.f32 %v1325_v44, %v640_v56  ;;  %v1089_v59 = vpop.f32.mrb[18].mxu1 }
 0x1e0   :  { %v721_v60 = vmul.f32 0.2, %v649_v55  ;;  %v652_v61 = vadd.f32 %v1089_v59, %v1325_v44  ;;  %v643_v63 = vpop.f32.mrb[19].mxu1 }
 0x1e1   :  { %v719_v0 = vmul.f32 0.2, %v641_v58  ;;  %v644_v2 = vadd.f32 %v1325_v44, %v643_v63 }
 0x1e2   :  { %v722_v3 = vmul.f32 0.2, %v652_v61  ;;  %v753_v5 = vmax.f32 %v649_v55, %v721_v60 }
 0x1e3   :  { %v720_v4 = vmul.f32 0.2, %v644_v2  ;;  %v751_v7 = vmax.f32 %v641_v58, %v719_v0  ;;  %v804_v0 = vsel %vm164_vm0, %v1342_v19, 0  ;;  %v813_v19 = vsel %vm164_vm0, %v1347_v35, 0  ;;  %v788_v35 = vpop.permute.xlu0 %787 }
 0x1e4   :  { %v754_v6 = vmax.f32 %v652_v61, %v722_v3 }
 0x1e5   :  { %v752_v8 = vmax.f32 %v644_v2, %v720_v4  ;;  %v1092_v9 = vpop.f32.mrb[20].mxu1 }
 0x1e6   :  { %v778_v10 = vpack.c.bf16 %v754_v6, %v753_v5  ;;  %v665_v11 = vadd.f32 %v1092_v9, %v1325_v44  ;;  %v656_v12 = vpop.f32.mrb[21].mxu1 }
 0x1e7   :  { %v777_v13 = vpack.c.bf16 %v752_v8, %v751_v7  ;;  %v657_v14 = vadd.f32 %v1325_v44, %v656_v12  ;;  %v1093_v15 = vpop.f32.mrb[22].mxu1  ;;  %v807_v12 = vsel %vm164_vm0, %v1339_v16, 0  ;;  %v819_v16 = vsel %vm164_vm0, %v1355_v54, 0 }
 0x1e8   :  { %v725_v17 = vmul.f32 0.2, %v665_v11  ;;  %v668_v18 = vadd.f32 %v1093_v15, %v1325_v44  ;;  %v659_v20 = vpop.f32.mrb[23].mxu1 }
 0x1e9   :  { %v723_v21 = vmul.f32 0.2, %v657_v14  ;;  %v660_v23 = vadd.f32 %v1325_v44, %v659_v20  ;;  %1102 = vmatprep.subr.msk.bf16.mxu0 %vm164_vm0, %v777_v13  ;;  %v816_v13 = vsel %vm164_vm0, %v1358_v57, 0 }
 0x1ea   :  { %v726_v25 = vmul.f32 0.2, %v668_v18  ;;  %1009 = vmatpush3.bf16.xpose.msra.mxu0 %v798_v24  ;;  %v757_v27 = vmax.f32 %v665_v11, %v725_v17  ;;  %v1136_v17 = vmov 1966171168  }
 0x1eb   :  { %v724_v26 = vmul.f32 0.2, %v660_v23  ;;  %1103 = vmatprep.subr.msk.bf16.mxu0 %vm164_vm0, %v778_v10  ;;  %v755_v29 = vmax.f32 %v657_v14, %v723_v21 }
 0x1ec   :  { %v758_v28 = vmax.f32 %v668_v18, %v726_v25  ;;  %v890_v18 = vunpack.c.l.s4 %v1136_v17 }
 0x1ed   :  { %v756_v30 = vmax.f32 %v660_v23, %v724_v26  ;;  %v1096_v31 = vpop.f32.mrb[24].mxu1 }
 0x1ee   :  { %v780_v32 = vpack.c.bf16 %v758_v28, %v757_v27  ;;  %v681_v33 = vadd.f32 %v1096_v31, %v1325_v44  ;;  %v672_v34 = vpop.f32.mrb[25].mxu1  ;;  %v891_v21 = vunpack.c.0.s8 %v890_v18 }
 0x1ef   :  { %v779_v36 = vpack.c.bf16 %v756_v30, %v755_v29  ;;  %v673_v37 = vadd.f32 %v1325_v44, %v672_v34  ;;  %v1097_v39 = vpop.f32.mrb[26].mxu1 }
 0x1f0   :  { %v729_v40 = vmul.f32 0.2, %v681_v33  ;;  %v684_v1 = vadd.f32 %v1097_v39, %v1325_v44  ;;  %v675_v22 = vpop.f32.mrb[27].mxu1 }
 0x1f1   :  { %v727_v43 = vmul.f32 0.2, %v673_v37  ;;  %v676_v45 = vadd.f32 %v1325_v44, %v675_v22 }
 0x1f2   :  { %v761_v46 = vmax.f32 %v681_v33, %v729_v40  ;;  %1011 = vmatpush3.bf16.xpose.msra.mxu0 %v801_v42  ;;  %v730_v47 = vmul.f32 0.2, %v684_v1 }
 0x1f3   :  { %v759_v48 = vmax.f32 %v673_v37, %v727_v43  ;;  %1104 = vmatprep.subr.msk.bf16.mxu0 %vm164_vm0, %v779_v36  ;;  %v728_v49 = vmul.f32 0.2, %v676_v45 }
 0x1f4   :  { %v762_v50 = vmax.f32 %v684_v1, %v730_v47 }
 0x1f5   :  { %v760_v51 = vmax.f32 %v676_v45, %v728_v49  ;;  %v1100_v52 = vpop.f32.mrb[28].mxu1 }
 0x1f6   :  { %v782_v53 = vpack.c.bf16 %v762_v50, %v761_v46  ;;  %v697_v55 = vadd.f32 %v1100_v52, %v1325_v44  ;;  %v688_v56 = vpop.f32.mrb[29].mxu1 }
 0x1f7   :  { %v781_v58 = vpack.c.bf16 %v760_v51, %v759_v48  ;;  %v689_v62 = vadd.f32 %v1325_v44, %v688_v56  ;;  %v1101_v59 = vpop.f32.mrb[30].mxu1 }
 0x1f8   :  { %v733_v60 = vmul.f32 0.2, %v697_v55  ;;  %v700_v61 = vadd.f32 %v1101_v59, %v1325_v44  ;;  %v691_v63 = vpop.f32.mrb[31].mxu1 }
 0x1f9   :  { %v731_v2 = vmul.f32 0.2, %v689_v62  ;;  %v692_v3 = vadd.f32 %v1325_v44, %v691_v63  ;;  %v810_v44 = vsel %vm164_vm0, %v1350_v38, 0  ;;  %v790_v38 = vlaneseq }
 0x1fa   :  { %1013 = vmatpush3.bf16.xpose.msra.mxu0 %v804_v0  ;;  %v765_v4 = vmax.f32 %v697_v55, %v733_v60  ;;  %v734_v5 = vmul.f32 0.2, %v700_v61 }
 0x1fb   :  { %1105 = vmatprep.subr.msk.bf16.mxu0 %vm164_vm0, %v780_v32  ;;  %v763_v6 = vmax.f32 %v689_v62, %v731_v2  ;;  %v732_v7 = vmul.f32 0.2, %v692_v3  ;;  %v791_v14 = vshrl.u32 %v790_v38, 7  ;;  %vm906_vm2 = vcmp.lt.s32.totalorder %v790_v38, 256 }
 0x1fc   :  { %v766_v8 = vmax.f32 %v700_v61, %v734_v5 }
 0x1fd   :  { %v764_v9 = vmax.f32 %v692_v3, %v732_v7  ;;  %v792_v15 = vsub.s32 0, %v791_v14  ;;  %v894_v26 = vsub.s32 %v891_v21, %v791_v14 }
 0x1fe   :  { %v784_v10 = vpack.c.bf16 %v766_v8, %v765_v4 }
 0x1ff   :  { %v783_v11 = vpack.c.bf16 %v764_v9, %v763_v6  ;;  %v793_v20 = vrot.slane %v788_v35, %v792_v15 }
 0x202   :  { %1015 = vmatpush3.bf16.xpose.msra.mxu0 %v807_v12 }
 0x203   :  { %1106 = vmatprep.subr.msk.bf16.mxu0 %vm164_vm0, %v781_v58 }
 0x20a   :  { %1017 = vmatpush3.bf16.xpose.msra.mxu0 %v810_v44 }
 0x20b   :  { %1107 = vmatprep.subr.msk.bf16.mxu0 %vm164_vm0, %v782_v53 }
 0x212   :  { %1019 = vmatpush3.bf16.xpose.msra.mxu0 %v813_v19 }
 0x213   :  { %1108 = vmatprep.subr.msk.bf16.mxu0 %vm164_vm0, %v783_v11 }
 0x21a   :  { %1021 = vmatpush3.bf16.xpose.msra.mxu0 %v816_v13 }
 0x21b   :  { %1109 = vmatprep.subr.msk.bf16.mxu0 %vm164_vm0, %v784_v10 }
 0x222   :  { %1023 = vmatpush3.bf16.xpose.msra.mxu0 %v819_v16 }
 0x229   :  { %1025 = vmatmul.mubr.msk.bf16.vlgmr.msra.gmra.mrb[32].mxu0 %vm164_vm0, %v1315_v41 }
 0x2fc   :  { %v879_v23 = vpop.f32.mrb[32].mxu0 }
 0x2fd   :  { %v880_v57 = vadd.f32 %v879_v23, %v793_v20  ;;  %v881_v24 = vpop.f32.mrb[33].mxu0 }
 0x2fe   :  { %v882_v25 = vadd.f32 %v881_v24, %v793_v20  ;;  %v883_v27 = vpop.f32.mrb[34].mxu0 }
 0x2ff   :  { %v884_v28 = vpop.f32.mrb[35].mxu0 }
 0x300   :  { %v888_v54 = vcombine.low %v880_v57, %v882_v25 }
 0x302   :  { %v895_v29 = vrot.slane %v888_v54, %v894_v26 }
 0x304   :  { %v902_v30 = vrot.slane %v895_v29, %v894_v26 }
 0x306   :  { %908 = vst.msk [vmem:[%s1411_s7] sm:$0x3] %vm906_vm2, %v902_v30 }

</bundles_post_ra>
